<compile_context>
chip_gen: v7x
topology: tpu7x:2x2x1
jax: 0.10.0
libtpu: 0.0.40
codegen_flags: <defaults>
</compile_context>

<pallas_src>
import functools

import jax
import jax.numpy as jnp
from jax import lax
from jax.experimental import pallas as pl
from jax.experimental.pallas import tpu as pltpu


def mlp_kernel(x_ref,
               w1_ref, b1_ref,
               w2_ref, b2_ref,
               w3_ref, b3_ref,
               w45_ref, b45_ref,
               o_ref, *, matmul_dtype):
    # x_ref: (TILE_B, input_dim) -- untransposed tile straight from HBM.
    x = x_ref[...].astype(matmul_dtype)

    # Layer 1: contract the feature axis of both operands -> (64, TILE_B).
    # This puts the batch on the 128-wide lane axis for the rest of the net.
    h = lax.dot_general(w1_ref[...].astype(matmul_dtype), x,
                        (((1,), (1,)), ((), ())),
                        preferred_element_type=jnp.float32)
    h = jnp.maximum(h + b1_ref[...], 0.0)

    # Layer 2 + relu.
    h = jnp.dot(w2_ref[...].astype(matmul_dtype), h.astype(matmul_dtype),
                preferred_element_type=jnp.float32)
    h = jnp.maximum(h + b2_ref[...], 0.0)

    # Layer 3 + relu.
    h = jnp.dot(w3_ref[...].astype(matmul_dtype), h.astype(matmul_dtype),
                preferred_element_type=jnp.float32)
    h = jnp.maximum(h + b3_ref[...], 0.0)

    # Layers 4+5 fused into one affine map (no activation in between).
    z = jnp.dot(w45_ref[...].astype(matmul_dtype), h.astype(matmul_dtype),
                preferred_element_type=jnp.float32) + b45_ref[...]

    # Sigmoid on the EUP; lane-dense store of shape (out_dim, TILE_B).
    o_ref[...] = jax.nn.sigmoid(z).astype(o_ref.dtype)


@functools.partial(jax.jit, static_argnames=("tile_b", "matmul_dtype"))
def mlp_forward(x, params, *, tile_b=8192, matmul_dtype=jnp.float32):
    """x: (B, input_dim); params in PyTorch layout: W (out, in), b (out, 1)."""
    (w1, b1, w2, b2, w3, b3, w4, b4, w5, b5) = params

    # Fold linear4 into linear5: W5 (W4 h + b4) + b5 = (W5 W4) h + (W5 b4 + b5)
    w45 = w5 @ w4                 # (out_dim, 32)
    b45 = w5 @ b4 + b5            # (out_dim, 1)

    B, in_dim = x.shape
    out_dim = w5.shape[0]

    LANE = 128

    def round_up(a, m):
        return ((a + m - 1) // m) * m

    # Tile cap: a multiple of 128 lanes (>= 128).  VMEM budget at tb=8192:
    # ~4.3 MB of live intermediates + ~0.7 MB double-buffered IO -- safe even
    # under the 32 MiB scoped limit / v7x's 64 MiB physical VMEM.
    tb_cap = max(LANE, (tile_b // LANE) * LANE)
    # Ensure >= 2 grid steps whenever B > 128 so "parallel" can shard across
    # both v7x TensorCores; small batches are rounded up to one 128-lane tile.
    tb = min(tb_cap, round_up(max(1, -(-B // 2)), LANE))

    n_tiles = -(-B // tb)
    b_pad = n_tiles * tb          # padded output width; x itself is NOT padded

    def const_spec(shape):
        return pl.BlockSpec(shape, lambda i: (0, 0))

    kernel = functools.partial(mlp_kernel, matmul_dtype=matmul_dtype)

    out_t = pl.pallas_call(
        kernel,
        out_shape=jax.ShapeDtypeStruct((out_dim, b_pad), jnp.float32),
        grid=(n_tiles,),
        in_specs=[
            # x tiled over the batch; last block may read OOB rows (garbage),
            # harmless because batch columns are independent and sliced off.
            pl.BlockSpec((tb, in_dim), lambda i: (i, 0)),
            const_spec(w1.shape), const_spec(b1.shape),
            const_spec(w2.shape), const_spec(b2.shape),
            const_spec(w3.shape), const_spec(b3.shape),
            const_spec(w45.shape), const_spec(b45.shape),
        ],
        out_specs=pl.BlockSpec((out_dim, tb), lambda i: (0, i)),
        compiler_params=pltpu.CompilerParams(
            dimension_semantics=("parallel",),
            vmem_limit_bytes=32 * 1024 * 1024,
        ),
    )(x, w1, b1, w2, b2, w3, b3, w45, b45)

    # Back to (B, out_dim) row-major like the PyTorch module (output is tiny).
    return out_t[:, :B].T


def init_params(key, input_dim, output_dim):
    """Deterministic init matching the nn.Linear shapes (PyTorch layout)."""
    dims = [(input_dim, 64), (64, 32), (32, 32), (32, 16), (16, output_dim)]
    params = []
    for (d_in, d_out) in dims:
        key, kw, kb = jax.random.split(key, 3)
        bound = 1.0 / (d_in ** 0.5)
        w = jax.random.uniform(kw, (d_out, d_in), jnp.float32, -bound, bound)
        b = jax.random.uniform(kb, (d_out, 1), jnp.float32, -bound, bound)
        params += [w, b]
    return params


def reference_forward(x, params):
    """Pure-JAX reference with the exact (unfused) module semantics."""
    w1, b1, w2, b2, w3, b3, w4, b4, w5, b5 = params
    h = jnp.maximum(x @ w1.T + b1.T, 0.0)
    h = jnp.maximum(h @ w2.T + b2.T, 0.0)
    h = jnp.maximum(h @ w3.T + b3.T, 0.0)
    h = h @ w4.T + b4.T
    return jax.nn.sigmoid(h @ w5.T + b5.T)


if __name__ == "__main__":
    key = jax.random.PRNGKey(0)
    key, kx, kx2 = jax.random.split(key, 3)

    batch = 8
    input_dim = 10    # bank-churn style feature count
    output_dim = 1    # binary churn probability

    params = init_params(key, input_dim, output_dim)

    # Small batch: single 128-lane tile, x block reads OOB rows (harmless).
    x = jax.random.normal(kx, (batch, input_dim), jnp.float32)
    out = jax.block_until_ready(mlp_forward(x, params))
    ref = reference_forward(x, params)
    assert out.shape == (batch, output_dim)
    assert jnp.allclose(out, ref, atol=1e-5, rtol=1e-5)

    # Ragged, multi-step grid: tb=256 -> 2 parallel steps, partial last block.
    x2 = jax.random.normal(kx2, (300, input_dim), jnp.float32)
    out2 = jax.block_until_ready(mlp_forward(x2, params))
    ref2 = reference_forward(x2, params)
    assert out2.shape == (300, output_dim)
    assert jnp.allclose(out2, ref2, atol=1e-5, rtol=1e-5)

    # bf16 MXU-operand path (v6e/v7x cadence win), f32 accumulation.
    # TODO(synk): make bf16 the default on v6e/v7x once tolerance is re-baselined.
    out3 = jax.block_until_ready(
        mlp_forward(x2, params, matmul_dtype=jnp.bfloat16))
    assert out3.shape == (300, output_dim)
    assert jnp.allclose(out3, ref2, atol=1e-2, rtol=1e-2)

    print("KERNEL_OK")
</pallas_src>

<mosaic_0001>
module attributes {stable_mosaic.version = 11 : i64} {
  func.func @mlp_kernel(%arg0: i32, %arg1: memref<128x10xf32, #tpu.memory_space<vmem>>, %arg2: memref<64x10xf32, #tpu.memory_space<vmem>>, %arg3: memref<64x1xf32, #tpu.memory_space<vmem>>, %arg4: memref<32x64xf32, #tpu.memory_space<vmem>>, %arg5: memref<32x1xf32, #tpu.memory_space<vmem>>, %arg6: memref<32x32xf32, #tpu.memory_space<vmem>>, %arg7: memref<32x1xf32, #tpu.memory_space<vmem>>, %arg8: memref<1x32xf32, #tpu.memory_space<vmem>>, %arg9: memref<1x1xf32, #tpu.memory_space<vmem>>, %arg10: memref<1x128xf32, #tpu.memory_space<vmem>>) attributes {dimension_semantics = [#tpu.dimension_semantics<parallel>], iteration_bounds = array<i64: 1>, scalar_prefetch = 0 : i64, scratch_operands = 0 : i64, tpu.core_type = #tpu.core_type<tc>, window_params = [{transform_indices = @transform_0, window_bounds = array<i64: 128, 10>}, {pipeline_mode = #tpu.pipeline_mode<synchronous>, transform_indices = @transform_1, window_bounds = array<i64: 64, 10>}, {pipeline_mode = #tpu.pipeline_mode<synchronous>, transform_indices = @transform_2, window_bounds = array<i64: 64, 1>}, {pipeline_mode = #tpu.pipeline_mode<synchronous>, transform_indices = @transform_3, window_bounds = array<i64: 32, 64>}, {pipeline_mode = #tpu.pipeline_mode<synchronous>, transform_indices = @transform_4, window_bounds = array<i64: 32, 1>}, {pipeline_mode = #tpu.pipeline_mode<synchronous>, transform_indices = @transform_5, window_bounds = array<i64: 32, 32>}, {pipeline_mode = #tpu.pipeline_mode<synchronous>, transform_indices = @transform_6, window_bounds = array<i64: 32, 1>}, {pipeline_mode = #tpu.pipeline_mode<synchronous>, transform_indices = @transform_7, window_bounds = array<i64: 1, 32>}, {pipeline_mode = #tpu.pipeline_mode<synchronous>, transform_indices = @transform_8, window_bounds = array<i64: 1, 1>}, {transform_indices = @transform_9, window_bounds = array<i64: 1, 128>}]} {
    %c0 = arith.constant 0 : index
    %c0_0 = arith.constant 0 : index
    %0 = vector.load %arg1[%c0, %c0_0] : memref<128x10xf32, #tpu.memory_space<vmem>>, vector<128x10xf32>
    %c0_1 = arith.constant 0 : index
    %c0_2 = arith.constant 0 : index
    %1 = vector.load %arg2[%c0_1, %c0_2] : memref<64x10xf32, #tpu.memory_space<vmem>>, vector<64x10xf32>
    %cst = arith.constant dense<0.000000e+00> : vector<64x128xf32>
    %2 = tpu.matmul %1, %0, %cst {dimension_numbers = #tpu.dot_dimension_numbers<[1], [1], [0], [0], [0, 0, 1, 0], [], []>} : vector<64x10xf32>, vector<128x10xf32>, vector<64x128xf32> -> vector<64x128xf32>
    %c0_3 = arith.constant 0 : index
    %c0_4 = arith.constant 0 : index
    %3 = vector.load %arg3[%c0_3, %c0_4] : memref<64x1xf32, #tpu.memory_space<vmem>>, vector<64x1xf32>
    %4 = vector.broadcast %3 : vector<64x1xf32> to vector<64x128xf32>
    %5 = arith.addf %2, %4 : vector<64x128xf32>
    %cst_5 = arith.constant 0.000000e+00 : f32
    %6 = vector.broadcast %cst_5 : f32 to vector<64x128xf32>
    %7 = arith.maximumf %5, %6 : vector<64x128xf32>
    %c0_6 = arith.constant 0 : index
    %c0_7 = arith.constant 0 : index
    %8 = vector.load %arg4[%c0_6, %c0_7] : memref<32x64xf32, #tpu.memory_space<vmem>>, vector<32x64xf32>
    %cst_8 = arith.constant dense<0.000000e+00> : vector<32x128xf32>
    %9 = tpu.matmul %8, %7, %cst_8 {dimension_numbers = #tpu.dot_dimension_numbers<[1], [0], [0], [1], [0, 0, 1, 1], [], []>} : vector<32x64xf32>, vector<64x128xf32>, vector<32x128xf32> -> vector<32x128xf32>
    %c0_9 = arith.constant 0 : index
    %c0_10 = arith.constant 0 : index
    %10 = vector.load %arg5[%c0_9, %c0_10] : memref<32x1xf32, #tpu.memory_space<vmem>>, vector<32x1xf32>
    %11 = vector.broadcast %10 : vector<32x1xf32> to vector<32x128xf32>
    %12 = arith.addf %9, %11 : vector<32x128xf32>
    %cst_11 = arith.constant 0.000000e+00 : f32
    %13 = vector.broadcast %cst_11 : f32 to vector<32x128xf32>
    %14 = arith.maximumf %12, %13 : vector<32x128xf32>
    %c0_12 = arith.constant 0 : index
    %c0_13 = arith.constant 0 : index
    %15 = vector.load %arg6[%c0_12, %c0_13] : memref<32x32xf32, #tpu.memory_space<vmem>>, vector<32x32xf32>
    %cst_14 = arith.constant dense<0.000000e+00> : vector<32x128xf32>
    %16 = tpu.matmul %15, %14, %cst_14 {dimension_numbers = #tpu.dot_dimension_numbers<[1], [0], [0], [1], [0, 0, 1, 1], [], []>} : vector<32x32xf32>, vector<32x128xf32>, vector<32x128xf32> -> vector<32x128xf32>
    %c0_15 = arith.constant 0 : index
    %c0_16 = arith.constant 0 : index
    %17 = vector.load %arg7[%c0_15, %c0_16] : memref<32x1xf32, #tpu.memory_space<vmem>>, vector<32x1xf32>
    %18 = vector.broadcast %17 : vector<32x1xf32> to vector<32x128xf32>
    %19 = arith.addf %16, %18 : vector<32x128xf32>
    %cst_17 = arith.constant 0.000000e+00 : f32
    %20 = vector.broadcast %cst_17 : f32 to vector<32x128xf32>
    %21 = arith.maximumf %19, %20 : vector<32x128xf32>
    %c0_18 = arith.constant 0 : index
    %c0_19 = arith.constant 0 : index
    %22 = vector.load %arg8[%c0_18, %c0_19] : memref<1x32xf32, #tpu.memory_space<vmem>>, vector<1x32xf32>
    %cst_20 = arith.constant dense<0.000000e+00> : vector<1x128xf32>
    %23 = tpu.matmul %22, %21, %cst_20 {dimension_numbers = #tpu.dot_dimension_numbers<[1], [0], [0], [1], [0, 0, 1, 1], [], []>} : vector<1x32xf32>, vector<32x128xf32>, vector<1x128xf32> -> vector<1x128xf32>
    %c0_21 = arith.constant 0 : index
    %c0_22 = arith.constant 0 : index
    %24 = vector.load %arg9[%c0_21, %c0_22] : memref<1x1xf32, #tpu.memory_space<vmem>>, vector<1x1xf32>
    %25 = vector.broadcast %24 : vector<1x1xf32> to vector<1x128xf32>
    %26 = arith.addf %23, %25 : vector<1x128xf32>
    %27 = arith.negf %26 : vector<1x128xf32>
    %28 = math.exp %27 : vector<1x128xf32>
    %cst_23 = arith.constant 1.000000e+00 : f32
    %29 = vector.broadcast %cst_23 : f32 to vector<1x128xf32>
    %30 = arith.addf %29, %28 : vector<1x128xf32>
    %31 = arith.divf %29, %30 : vector<1x128xf32>
    %c0_24 = arith.constant 0 : index
    %c0_25 = arith.constant 0 : index
    %32 = vector.load %arg10[%c0_24, %c0_25] : memref<1x128xf32, #tpu.memory_space<vmem>>, vector<1x128xf32>
    tpu.vector_store %arg10[%c0_24, %c0_25], %31 {strides = array<i32>} : memref<1x128xf32, #tpu.memory_space<vmem>>, vector<1x128xf32>,
    return
  }
  func.func @transform_0(%arg0: i32) -> (i32, i32) {
    %c0_i32 = arith.constant 0 : i32
    %c0_i32_0 = arith.constant 0 : i32
    return %arg0, %c0_i32 : i32, i32
  }
  func.func @transform_1(%arg0: i32) -> (i32, i32) {
    %c0_i32 = arith.constant 0 : i32
    %c0_i32_0 = arith.constant 0 : i32
    %c0_i32_1 = arith.constant 0 : i32
    return %c0_i32, %c0_i32_0 : i32, i32
  }
  func.func @transform_2(%arg0: i32) -> (i32, i32) {
    %c0_i32 = arith.constant 0 : i32
    %c0_i32_0 = arith.constant 0 : i32
    %c0_i32_1 = arith.constant 0 : i32
    return %c0_i32, %c0_i32_0 : i32, i32
  }
  func.func @transform_3(%arg0: i32) -> (i32, i32) {
    %c0_i32 = arith.constant 0 : i32
    %c0_i32_0 = arith.constant 0 : i32
    %c0_i32_1 = arith.constant 0 : i32
    return %c0_i32, %c0_i32_0 : i32, i32
  }
  func.func @transform_4(%arg0: i32) -> (i32, i32) {
    %c0_i32 = arith.constant 0 : i32
    %c0_i32_0 = arith.constant 0 : i32
    %c0_i32_1 = arith.constant 0 : i32
    return %c0_i32, %c0_i32_0 : i32, i32
  }
  func.func @transform_5(%arg0: i32) -> (i32, i32) {
    %c0_i32 = arith.constant 0 : i32
    %c0_i32_0 = arith.constant 0 : i32
    %c0_i32_1 = arith.constant 0 : i32
    return %c0_i32, %c0_i32_0 : i32, i32
  }
  func.func @transform_6(%arg0: i32) -> (i32, i32) {
    %c0_i32 = arith.constant 0 : i32
    %c0_i32_0 = arith.constant 0 : i32
    %c0_i32_1 = arith.constant 0 : i32
    return %c0_i32, %c0_i32_0 : i32, i32
  }
  func.func @transform_7(%arg0: i32) -> (i32, i32) {
    %c0_i32 = arith.constant 0 : i32
    %c0_i32_0 = arith.constant 0 : i32
    %c0_i32_1 = arith.constant 0 : i32
    return %c0_i32, %c0_i32_0 : i32, i32
  }
  func.func @transform_8(%arg0: i32) -> (i32, i32) {
    %c0_i32 = arith.constant 0 : i32
    %c0_i32_0 = arith.constant 0 : i32
    %c0_i32_1 = arith.constant 0 : i32
    return %c0_i32, %c0_i32_0 : i32, i32
  }
  func.func @transform_9(%arg0: i32) -> (i32, i32) {
    %c0_i32 = arith.constant 0 : i32
    %c0_i32_0 = arith.constant 0 : i32
    return %c0_i32, %arg0 : i32, i32
  }
}

</mosaic_0001>

<bundles_post_ra>
// kernel: mlp_forward.1
= control target key start
LH: loop header
LB: loop body
LE: loop exit
PB: predicated region body
PF: predicated region fallthrough
CT: control target
= control target key end

     0   :  { %vm106_vm0 = vcmask 80896   ;;  %v909_v3 = vmov 0   ;;  %vm320_vm2 = vcmask 523264   ;;  %vm450_vm3 = vcmask 261120   ;;  %s1171_s0 = inlined_call_operand.vmem [shape: f32[8,10], index: 0, kind: input, shape index: {}]   ;;  %s1172_s8 = inlined_call_operand.<no memory space> [shape: f32[1,1], index: 8, kind: input, shape index: {}]   ;;  %s1173_s1 = inlined_call_operand.vmem [shape: f32[64,10], index: 1, kind: input, shape index: {}]   ;;  %s1174_s2 = inlined_call_operand.vmem [shape: f32[64,1], index: 2, kind: input, shape index: {}]   ;;  %s1175_s4 = inlined_call_operand.vmem [shape: f32[32,1], index: 4, kind: input, shape index: {}]   ;;  %s1176_s6 = inlined_call_operand.vmem [shape: f32[32,1], index: 6, kind: input, shape index: {}]   ;;  %s1177_s3 = inlined_call_operand.vmem [shape: f32[32,64], index: 3, kind: input, shape index: {}]   ;;  %s1178_s5 = inlined_call_operand.vmem [shape: f32[32,32], index: 5, kind: input, shape index: {}]   ;;  %s1179_s7 = inlined_call_operand.vmem [shape: f32[1,32], index: 7, kind: input, shape index: {}]   ;;  %s1180_s9 = inlined_call_operand.vmem [shape: f32[1,128], index: 9, kind: output, shape index: {}]  }
   0x1   :  { %v34_v0 = vld [vmem:[%s1171_s0] sm:$0xff]  ;;  %v35_v1 = vld [vmem:[%s1171_s0 + $0x8] sm:$0xff]  ;;  %vm971_vm1 = vmpackc.low %vm106_vm0, %vm106_vm0  ;;  %903 = vset.pattern.permute.xlu0 %v909_v3  ;;  %904 = vset.pattern.permute.xlu1 %v909_v3  ;;  %v14_v4 = vstv %s1172_s8  ;;  %vm911_vm4 = vmmov 0  }
   0x2   :  { %v821_v5 = vpack.c.bf16 %v35_v1, %v34_v0  ;;  %v36_v6 = vld [vmem:[%s1171_s0 + $0x10] sm:$0xff]  ;;  %v37_v7 = vld [vmem:[%s1171_s0 + $0x18] sm:$0xff]  ;;  %15 = vst [vmem:[#allocation2] sm:$0x1] %v14_v4  ;;  %v50_v9 = vld [vmem:[%s1173_s1] sm:$0xff] }
   0x3   :  { %v827_v8 = vpack.c.bf16 %v37_v7, %v36_v6  ;;  %v38_v10 = vld [vmem:[%s1171_s0 + $0x20] sm:$0xff]  ;;  %v39_v11 = vld [vmem:[%s1171_s0 + $0x28] sm:$0xff]  ;;  %762 = vmatprep.mubr.msk.f32.mxu0 %vm106_vm0, %v50_v9  ;;  %v60_v14 = vld [vmem:[%s1174_s2 + $0x10] sm:$0xff] }
   0x4   :  { %823 = vmatprep.subr.msk.bf16.mxu0 %vm971_vm1, %v821_v5  ;;  %v58_v12 = vld [vmem:[%s1174_s2] sm:$0xff]  ;;  %v833_v13 = vpack.c.bf16 %v39_v11, %v38_v10  ;;  %v59_v15 = vld [vmem:[%s1174_s2 + $0x8] sm:$0xff]  ;;  %78 = vperm.xlu1 %904, %v60_v14   ;;  %v61_v16 = vld [vmem:[%s1174_s2 + $0x18] sm:$0xff] }
   0x5   :  { %826 = vmatpush3.bf16.xpose.msk.msra.mxu0 %vm971_vm1, %v821_v5  ;;  %68 = vperm.xlu0 %903, %v58_v12   ;;  %v40_v17 = vld [vmem:[%s1171_s0 + $0x30] sm:$0xff]  ;;  %v41_v18 = vld [vmem:[%s1171_s0 + $0x38] sm:$0xff]  ;;  %v62_v19 = vld [vmem:[%s1174_s2 + $0x20] sm:$0xff] }
   0x6   :  { %829 = vmatprep.subr.msk.bf16.mxu0 %vm971_vm1, %v827_v8  ;;  %v63_v20 = vld [vmem:[%s1174_s2 + $0x28] sm:$0xff]  ;;  %v839_v21 = vpack.c.bf16 %v41_v18, %v40_v17  ;;  %v64_v22 = vld [vmem:[%s1174_s2 + $0x30] sm:$0xff]  ;;  %v65_v23 = vld [vmem:[%s1174_s2 + $0x38] sm:$0xff] }
   0x7   :  { %v42_v24 = vld [vmem:[%s1171_s0 + $0x40] sm:$0xff]  ;;  %v43_v25 = vld [vmem:[%s1171_s0 + $0x48] sm:$0xff]  ;;  %v298_v29 = vld [vmem:[%s1175_s4 + $0x10] sm:$0xff] }
   0x8   :  { %83 = vperm.xlu1 %904, %v61_v16   ;;  %v296_v26 = vld [vmem:[%s1175_s4] sm:$0xff]  ;;  %v297_v27 = vld [vmem:[%s1175_s4 + $0x8] sm:$0xff]  ;;  %v845_v28 = vpack.c.bf16 %v43_v25, %v42_v24  ;;  %v299_v30 = vld [vmem:[%s1175_s4 + $0x18] sm:$0xff] }
   0x9   :  { %73 = vperm.xlu0 %903, %v59_v15   ;;  %v44_v31 = vld [vmem:[%s1171_s0 + $0x50] sm:$0xff]  ;;  %v45_v32 = vld [vmem:[%s1171_s0 + $0x58] sm:$0xff]  ;;  %v426_v33 = vld [vmem:[%s1176_s6] sm:$0xff] }
   0xa   :  { %v427_v34 = vld [vmem:[%s1176_s6 + $0x8] sm:$0xff]  ;;  %v851_v35 = vpack.c.bf16 %v45_v32, %v44_v31  ;;  %v428_v36 = vld [vmem:[%s1176_s6 + $0x10] sm:$0xff]  ;;  %v429_v37 = vld [vmem:[%s1176_s6 + $0x18] sm:$0xff] }
   0xb   :  { %v46_v38 = vld [vmem:[%s1171_s0 + $0x60] sm:$0xff]  ;;  %v47_v39 = vld [vmem:[%s1171_s0 + $0x68] sm:$0xff]  ;;  %v48_v42 = vld [vmem:[%s1171_s0 + $0x70] sm:$0xff] }
   0xc   :  { %93 = vperm.xlu1 %904, %v63_v20   ;;  %v553_v40 = vld [vmem:[#allocation2] sm:$0x1]  ;;  %v857_v41 = vpack.c.bf16 %v47_v39, %v46_v38  ;;  %v49_v43 = vld [vmem:[%s1171_s0 + $0x78] sm:$0xff]  ;;  %v51_v45 = vld [vmem:[%s1173_s1 + $0x8] sm:$0xff] }
   0xd   :  { %832 = vmatpush3.bf16.xpose.msk.msra.mxu0 %vm971_vm1, %v827_v8  ;;  %88 = vperm.xlu0 %903, %v62_v19   ;;  %v863_v44 = vpack.c.bf16 %v49_v43, %v48_v42  ;;  %v52_v46 = vld [vmem:[%s1173_s1 + $0x10] sm:$0xff]  ;;  %v53_v47 = vld [vmem:[%s1173_s1 + $0x18] sm:$0xff]  ;;  %v54_v48 = vld [vmem:[%s1173_s1 + $0x20] sm:$0xff] }
   0xe   :  { %835 = vmatprep.subr.msk.bf16.mxu0 %vm971_vm1, %v833_v13  ;;  %v55_v49 = vld [vmem:[%s1173_s1 + $0x28] sm:$0xff]  ;;  %v56_v50 = vld [vmem:[%s1173_s1 + $0x30] sm:$0xff]  ;;  %v57_v51 = vld [vmem:[%s1173_s1 + $0x38] sm:$0xff] }
   0xf   :  { %v292_v52 = vld [vmem:[%s1177_s3] sm:$0xff]  ;;  %v293_v25 = vld [vmem:[%s1177_s3 + $0x8] sm:$0xff] }
  0x10   :  { %103 = vperm.xlu1 %904, %v65_v23   ;;  %790 = vmatprep.mubr.msk.f32.mxu1 %vm320_vm2, %v292_v52 }
  0x11   :  { %98 = vperm.xlu0 %903, %v64_v22  }
  0x14   :  { %307 = vperm.xlu1 %904, %v297_v27   ;;  %v295_v27 = vld [vmem:[%s1177_s3 + $0x18] sm:$0xff] }
  0x15   :  { %838 = vmatpush3.bf16.xpose.msk.msra.mxu0 %vm971_vm1, %v833_v13  ;;  %302 = vperm.xlu0 %903, %v296_v26   ;;  %v294_v26 = vld [vmem:[%s1177_s3 + $0x10] sm:$0xff] }
  0x16   :  { %841 = vmatprep.subr.msk.bf16.mxu0 %vm971_vm1, %v839_v21 }
  0x18   :  { %317 = vperm.xlu1 %904, %v299_v30  }
  0x19   :  { %312 = vperm.xlu0 %903, %v298_v29  }
  0x1c   :  { %437 = vperm.xlu1 %904, %v427_v34  }
  0x1d   :  { %844 = vmatpush3.bf16.xpose.msk.msra.mxu0 %vm971_vm1, %v839_v21  ;;  %432 = vperm.xlu0 %903, %v426_v33  }
  0x1e   :  { %847 = vmatprep.subr.msk.bf16.mxu0 %vm971_vm1, %v845_v28 }
  0x20   :  { %447 = vperm.xlu1 %904, %v429_v37  }
  0x21   :  { %442 = vperm.xlu0 %903, %v428_v36  }
  0x25   :  { %850 = vmatpush3.bf16.xpose.msk.msra.mxu0 %vm971_vm1, %v845_v28  ;;  %556 = vperm.xlu0 %903, %v553_v40   ;;  %v422_v28 = vld [vmem:[%s1178_s5] sm:$0xff] }
  0x26   :  { %853 = vmatprep.subr.msk.bf16.mxu0 %vm971_vm1, %v851_v35 }
  0x2d   :  { %856 = vmatpush3.bf16.xpose.msk.msra.mxu0 %vm971_vm1, %v851_v35 }
  0x2e   :  { %859 = vmatprep.subr.msk.bf16.mxu0 %vm971_vm1, %v857_v41 }
  0x35   :  { %862 = vmatpush3.bf16.xpose.msk.msra.mxu0 %vm971_vm1, %v857_v41 }
  0x36   :  { %865 = vmatprep.subr.msk.bf16.mxu0 %vm971_vm1, %v863_v44 }
  0x3d   :  { %868 = vmatpush3.bf16.xpose.msk.msra.mxu0 %vm971_vm1, %v863_v44 }
  0x44   :  { %763 = vmatmul.mubr.msk.f32.vlgmr.msra.gmra.mrb[0].mxu0 %vm106_vm0, %v51_v45 }
  0x45   :  { %765 = vmatprep.mubr.msk.f32.mxu0 %vm106_vm0, %v52_v46 }
  0x48   :  { %766 = vmatmul.mubr.msk.f32.gmra.mrb[2].mxu0 %vm106_vm0, %v53_v47  ;;  %v423_v47 = vld [vmem:[%s1178_s5 + $0x8] sm:$0xff] }
  0x49   :  { %768 = vmatprep.mubr.msk.f32.mxu0 %vm106_vm0, %v54_v48  ;;  %v424_v48 = vld [vmem:[%s1178_s5 + $0x10] sm:$0xff] }
  0x4c   :  { %769 = vmatmul.mubr.msk.f32.gmra.mrb[4].mxu0 %vm106_vm0, %v55_v49  ;;  %v425_v49 = vld [vmem:[%s1178_s5 + $0x18] sm:$0xff] }
  0x4d   :  { %771 = vmatprep.mubr.msk.f32.mxu0 %vm106_vm0, %v56_v50  ;;  %v910_v50 = vmov 0.0|0.0  }
  0x50   :  { %772 = vmatmul.mubr.msk.f32.gmra.mrb[6].mxu0 %vm106_vm0, %v57_v51  ;;  %v912_v51 = vmov 0.0  }
  0x83   :  { %v79_v54 = vpop.permute.xlu1 %78 }
  0x84   :  { %v69_v53 = vpop.permute.xlu0 %68 }
  0x87   :  { %v84_v56 = vpop.permute.xlu1 %83 }
  0x88   :  { %v74_v55 = vpop.permute.xlu0 %73 }
  0x8b   :  { %v94_v2 = vpop.permute.xlu1 %93 }
  0x8c   :  { %v89_v5 = vpop.permute.xlu0 %88 }
  0x8f   :  { %v104_v14 = vpop.permute.xlu1 %103 }
  0x90   :  { %v99_v17 = vpop.permute.xlu0 %98 }
  0x93   :  { %v308_v29 = vpop.permute.xlu1 %307 }
  0x94   :  { %v303_v30 = vpop.permute.xlu0 %302 }
  0x97   :  { %v318_v36 = vpop.permute.xlu1 %317 }
  0x98   :  { %v313_v39 = vpop.permute.xlu0 %312 }
  0x9b   :  { %v438_v52 = vpop.permute.xlu1 %437 }
 0x117   :  { %v764_v57 = vpop.f32.mrb[0].mxu0 }
 0x118   :  { %v251_v58 = vadd.f32 %v764_v57, %v74_v55  ;;  %v245_v59 = vpop.f32.mrb[1].mxu0 }
 0x119   :  { %v246_v60 = vadd.f32 %v245_v59, %v69_v53  ;;  %v433_v53 = vpop.permute.xlu0 %432  ;;  %v448_v59 = vpop.permute.xlu1 %447 }
 0x11a   :  { %v285_v61 = vmax.f32 %v251_v58, 0.0 }
 0x11b   :  { %v284_v62 = vmax.f32 %v246_v60, 0.0  ;;  %v767_v63 = vpop.f32.mrb[2].mxu0 }
 0x11c   :  { %v261_v0 = vadd.f32 %v767_v63, %v84_v56  ;;  %v255_v1 = vpop.f32.mrb[3].mxu0 }
 0x11d   :  { %v256_v3 = vadd.f32 %v255_v1, %v79_v54  ;;  %v869_v4 = vpack.c.bf16 %v285_v61, %v284_v62  ;;  %v443_v62 = vpop.permute.xlu0 %442 }
 0x11e   :  { %v287_v6 = vmax.f32 %v261_v0, 0.0 }
 0x11f   :  { %v286_v7 = vmax.f32 %v256_v3, 0.0  ;;  %v770_v8 = vpop.f32.mrb[4].mxu0  ;;  %870 = vmatprep.subr.bf16.mxu1 %v869_v4 }
 0x120   :  { %v271_v9 = vadd.f32 %v770_v8, %v94_v2  ;;  %v265_v10 = vpop.f32.mrb[5].mxu0  ;;  %872 = vmatpush3.bf16.msra.mxu1 %v869_v4 }
 0x121   :  { %v873_v11 = vpack.c.bf16 %v287_v6, %v286_v7  ;;  %v266_v12 = vadd.f32 %v265_v10, %v89_v5  ;;  %v552_v6 = vld [vmem:[%s1179_s7] sm:$0x1]  ;;  %v559_v7 = vlaneseq  ;;  %v557_v10 = vpop.permute.xlu0 %556 }
 0x122   :  { %v289_v13 = vmax.f32 %v271_v9, 0.0 }
 0x123   :  { %v288_v15 = vmax.f32 %v266_v12, 0.0  ;;  %v773_v16 = vpop.f32.mrb[6].mxu0  ;;  %874 = vmatprep.subr.bf16.mxu1 %v873_v11  ;;  %v560_v8 = vshrl.u32 %v559_v7, 7 }
 0x124   :  { %v281_v18 = vadd.f32 %v773_v16, %v104_v14  ;;  %v275_v19 = vpop.f32.mrb[7].mxu0  ;;  %876 = vmatpush3.bf16.msra.mxu1 %v873_v11 }
 0x125   :  { %v877_v20 = vpack.c.bf16 %v289_v13, %v288_v15  ;;  %v276_v21 = vadd.f32 %v275_v19, %v99_v17  ;;  %v561_v9 = vsub.s32 0, %v560_v8 }
 0x126   :  { %v291_v22 = vmax.f32 %v281_v18, 0.0 }
 0x127   :  { %v290_v23 = vmax.f32 %v276_v21, 0.0  ;;  %878 = vmatprep.subr.bf16.mxu1 %v877_v20  ;;  %v562_v11 = vrot.slane %v557_v10, %v561_v9 }
 0x128   :  { %880 = vmatpush3.bf16.msra.mxu1 %v877_v20 }
 0x129   :  { %v881_v24 = vpack.c.bf16 %v291_v22, %v290_v23 }
 0x12b   :  { %882 = vmatprep.subr.bf16.mxu1 %v881_v24 }
 0x12c   :  { %884 = vmatpush3.bf16.msra.mxu1 %v881_v24 }
 0x12f   :  { %791 = vmatmul.mubr.msk.f32.vlgmr.msra.gmra.mrb[0].mxu1 %vm320_vm2, %v293_v25 }
 0x130   :  { %793 = vmatprep.mubr.msk.f32.mxu1 %vm320_vm2, %v294_v26 }
 0x133   :  { %794 = vmatmul.mubr.msk.f32.gmra.mrb[2].mxu1 %vm320_vm2, %v295_v27 }
 0x134   :  { %804 = vmatprep.mubr.msk.f32.mxu1 %vm450_vm3, %v422_v28 }
 0x202   :  { %v792_v31 = vpop.f32.mrb[0].mxu1 }
 0x203   :  { %v405_v32 = vadd.f32 %v792_v31, %v308_v29  ;;  %v399_v33 = vpop.f32.mrb[1].mxu1 }
 0x204   :  { %v400_v34 = vadd.f32 %v399_v33, %v303_v30 }
 0x205   :  { %v419_v35 = vmax.f32 %v405_v32, 0.0 }
 0x206   :  { %v418_v37 = vmax.f32 %v400_v34, 0.0  ;;  %v795_v38 = vpop.f32.mrb[2].mxu1 }
 0x207   :  { %v415_v40 = vadd.f32 %v795_v38, %v318_v36  ;;  %v409_v41 = vpop.f32.mrb[3].mxu1 }
 0x208   :  { %v885_v42 = vpack.c.bf16 %v419_v35, %v418_v37  ;;  %v410_v43 = vadd.f32 %v409_v41, %v313_v39 }
 0x209   :  { %v421_v44 = vmax.f32 %v415_v40, 0.0 }
 0x20a   :  { %v420_v45 = vmax.f32 %v410_v43, 0.0  ;;  %886 = vmatprep.subr.bf16.mxu1 %v885_v42 }
 0x20b   :  { %888 = vmatpush3.bf16.msra.mxu1 %v885_v42 }
 0x20c   :  { %v889_v46 = vpack.c.bf16 %v421_v44, %v420_v45 }
 0x20e   :  { %890 = vmatprep.subr.bf16.mxu1 %v889_v46 }
 0x20f   :  { %892 = vmatpush3.bf16.msra.mxu1 %v889_v46 }
 0x210   :  { %893 = vmatprep.subr.bf16.mxu1 %v910_v50 }
 0x212   :  { %805 = vmatmul.mubr.msk.f32.vlgmr.msra.gmra.mrb[4].mxu1 %vm450_vm3, %v423_v47 }
 0x213   :  { %807 = vmatprep.mubr.msk.f32.mxu1 %vm450_vm3, %v424_v48 }
 0x216   :  { %808 = vmatmul.mubr.msk.f32.gmra.mrb[6].mxu1 %vm450_vm3, %v425_v49 }
 0x217   :  { %818 = vmatprep.mubr.msk.f32.mxu1 %vm911_vm4, %v912_v51 }
 0x2e5   :  { %v806_v54 = vpop.f32.mrb[4].mxu1 }
 0x2e6   :  { %v535_v55 = vadd.f32 %v806_v54, %v438_v52  ;;  %v529_v56 = vpop.f32.mrb[5].mxu1 }
 0x2e7   :  { %v530_v57 = vadd.f32 %v529_v56, %v433_v53 }
 0x2e8   :  { %v549_v58 = vmax.f32 %v535_v55, 0.0 }
 0x2e9   :  { %v548_v60 = vmax.f32 %v530_v57, 0.0  ;;  %v809_v61 = vpop.f32.mrb[6].mxu1 }
 0x2ea   :  { %v545_v63 = vadd.f32 %v809_v61, %v448_v59  ;;  %v539_v0 = vpop.f32.mrb[7].mxu1 }
 0x2eb   :  { %v894_v1 = vpack.c.bf16 %v549_v58, %v548_v60  ;;  %v540_v2 = vadd.f32 %v539_v0, %v443_v62 }
 0x2ec   :  { %v551_v3 = vmax.f32 %v545_v63, 0.0 }
 0x2ed   :  { %v550_v4 = vmax.f32 %v540_v2, 0.0  ;;  %895 = vmatpush3.bf16.msra.mxu1 %v894_v1 }
 0x2ee   :  { %896 = vmatprep.subr.bf16.mxu1 %v910_v50 }
 0x2ef   :  { %v897_v5 = vpack.c.bf16 %v551_v3, %v550_v4 }
 0x2f1   :  { %898 = vmatpush3.bf16.msra.mxu1 %v897_v5 }
 0x2f4   :  { %819 = vmatmul.mubr.msk.f32.vlgmr.msra.gmra.mrb[8].mxu1 %vm450_vm3, %v552_v6 }
 0x3c7   :  { %v632_v12 = vpop.f32.mrb[8].mxu1 }
 0x3c8   :  { %v633_v13 = vadd.f32 %v632_v12, %v562_v11  ;;  %v820_v14 = vpop.f32.mrb[9].mxu1 }
 0x3ca   :  { %v680_v15 = vmul.f32 -1.442695, %v633_v13 }
 0x3cc   :  { %905 = vpow2.f32 %v680_v15 }
 0x3d6   :  { %v906_v16 = vpop.eup %905 }
 0x3d7   :  { %v639_v17 = vadd.f32 1.0, %v906_v16 }
 0x3d9   :  { %907 = vrcp.f32 %v639_v17 }
 0x3e3   :  { %v908_v18 = vpop.eup %907 }
 0x3e4   :  { %642 = vst [vmem:[%s1180_s9] sm:$0x1] %v908_v18 }

</bundles_post_ra>
